<compile_context>
chip_gen: v5e
topology: v5e:2x2
jax: 0.10.0
libtpu: 0.0.40
codegen_flags: <defaults>
</compile_context>

<pallas_src>
import jax
import jax.numpy as jnp
from jax.experimental import pallas as pl
from jax.experimental.pallas import tpu as pltpu


# ------------------------- packed-parameter layout -------------------------
R_WF = 0     # rows 0-9  : fused  W0^T @ W01^T          (10 x 100, lanes 0-99)
R_BF = 10    # row 10    : fused  b0 @ W01^T + b01      (lanes 0-99); lane 100 = 1.0 (b02 hook)
R_W02 = 11   # row 11    : lin0_2 weight as a row       (lanes 0-99); lane 100 = b02
R_B1 = 12    # row 12    : lin1 bias                    (lanes 0-99)
R_B2 = 13    # row 13    : lin2 bias                    (lanes 0-99); lane 127 = 1.0 (b3 hook)
# rows 14-15 : zero
R_W1T = 16   # rows 16-25: lin1 weight^T (10 x 100)     (lanes 0-99); rows 26-31 MUST be zero
R_W23 = 32   # rows 32-159: combined 128x128 block
             #   block rows 0-99 : lanes 0-99 = w2^T, lanes 100-101 = w3^T, rest 0
             #   block rows 100-126: all zero
             #   block row  127  : lanes 100-101 = b3, rest 0
P_ROWS = 160          # 160 x 128 f32 = 80 KiB (useful data ~50 KiB)
OUT_LANE = 100        # the two model outputs land at lanes 100-101 of the output row


def mlp_kernel(x_ref, p_ref, out_ref):
    f32 = jnp.float32

    # x_ref is a zero-padded (16,128) tile; only lanes 0-9 / rows 0-9 carry data.
    x = x_ref[:, 0:16]                       # (16,16): lanes 10-15 are exactly zero

    wf = p_ref[R_WF:R_WF + 16, :]            # (16,128) rows 10-15 are bias rows (inert: x pad = 0)
    bf = p_ref[R_BF:R_BF + 1, :]             # (1,128)  lane 100 == 1.0
    w02 = p_ref[R_W02:R_W02 + 1, :]          # (1,128)  lane 100 == b02
    b1 = p_ref[R_B1:R_B1 + 1, :]             # (1,128)
    b2 = p_ref[R_B2:R_B2 + 1, :]             # (1,128)  lane 127 == 1.0
    w1t = p_ref[R_W1T:R_W1T + 16, :]         # (16,128) rows 10-15 zero
    w23 = p_ref[R_W23:R_W23 + 128, :]        # (128,128) shared lin2 / lin3 block

    # --- lin0 folded into lin0_1 (+ReLU).  h1 lanes: 0-99 real, 100 == 1.0 (hook), 101-127 == 0.
    h1 = jnp.maximum(jnp.dot(x, wf, preferred_element_type=f32) + bf, 0.0)      # (16,128)

    # --- lin0_2 (+ReLU) as a lane reduction; b02 enters via the hook lane (h1[:,100] == 1).
    # (MXU alternative exists but the XLU is otherwise idle here.)
    h2 = jnp.maximum(jnp.sum(h1 * w02, axis=1, keepdims=True), 0.0)             # (16,1)

    # --- squeeze + lin1 (+ReLU): contraction over batch via broadcast-mul + sublane reduce.
    # w1t rows 10-15 are zero, so the garbage padded-batch rows of h2 drop out.
    v1 = jnp.maximum(jnp.sum(h2 * w1t, axis=0, keepdims=True) + b1, 0.0)        # (1,128)
    # v1 lanes 100-127 == 0  (b1 / w1t padded lanes are zero).

    # --- lin2 (+ReLU).  Block rows 100-127 are multiplied by v1's zero lanes -> exact.
    # Lanes 100-101 of v2 pick up the stashed w3 columns (garbage, provably harmless below);
    # lane 127 becomes exactly 1.0 (b3 hook, column 127 of the block is zero).
    v2 = jnp.maximum(jnp.dot(v1, w23, preferred_element_type=f32) + b2, 0.0)    # (1,128)

    # --- lin3 (+ReLU), re-using the same resident 128x128 block (zero extra DMA).
    # Output lanes 100-101 = sum_{k<100} v2[k]*w3[:,k] + 1.0*b3  (block rows 100-126 are zero,
    # so v2's garbage lanes contribute nothing).  Other lanes are don't-care and discarded.
    o = jnp.maximum(jnp.dot(v2, w23, preferred_element_type=f32), 0.0)          # (1,128)

    out_ref[...] = o                          # full-row, unmasked lane-dense store


# ------------------------------ param packing ------------------------------
def init_params(key):
    """Deterministic init mimicking nn.Linear default U(-1/sqrt(fan_in), +)."""
    def linear(key, out_f, in_f):
        kw, kb = jax.random.split(key)
        bound = 1.0 / jnp.sqrt(jnp.float32(in_f))
        w = jax.random.uniform(kw, (out_f, in_f), jnp.float32, -bound, bound)
        b = jax.random.uniform(kb, (out_f,), jnp.float32, -bound, bound)
        return w, b

    keys = jax.random.split(key, 6)
    return {
        "lin0": linear(keys[0], 100, 10),
        "lin0_1": linear(keys[1], 100, 100),
        "lin0_2": linear(keys[2], 1, 100),
        "lin1": linear(keys[3], 100, 10),
        "lin2": linear(keys[4], 100, 100),
        "lin3": linear(keys[5], 2, 100),
    }


def pack_params(params):
    """One-time packing into a single (160,128) f32 buffer (80 KiB)."""
    w0, b0 = params["lin0"]
    w01, b01 = params["lin0_1"]
    w02, b02 = params["lin0_2"]
    w1, b1 = params["lin1"]
    w2, b2 = params["lin2"]
    w3, b3 = params["lin3"]

    # Fold lin0 into lin0_1 (valid: no nonlinearity between them).
    wf = w0.T @ w01.T                    # (10, 100)
    bf = b0 @ w01.T + b01                # (100,)

    buf = jnp.zeros((P_ROWS, 128), jnp.float32)
    buf = buf.at[R_WF:R_WF + 10, 0:100].set(wf)
    buf = buf.at[R_BF, 0:100].set(bf)
    buf = buf.at[R_BF, 100].set(1.0)                     # b02 hook lane
    buf = buf.at[R_W02, 0:100].set(w02.reshape(100))
    buf = buf.at[R_W02, 100].set(b02[0])
    buf = buf.at[R_B1, 0:100].set(b1)
    buf = buf.at[R_B2, 0:100].set(b2)
    buf = buf.at[R_B2, 127].set(1.0)                     # b3 hook lane
    buf = buf.at[R_W1T:R_W1T + 10, 0:100].set(w1.T)
    buf = buf.at[R_W23:R_W23 + 100, 0:100].set(w2.T)
    buf = buf.at[R_W23:R_W23 + 100, 100:102].set(w3.T)   # stash w3^T in spare lanes
    buf = buf.at[R_W23 + 127, 100:102].set(b3)           # b3 picked up via the hook lane
    return buf


# ------------------------------- entry points -------------------------------
def _forward_padded(xp, packed):
    """xp: (N,16,128) zero-padded inputs; packed: (P_ROWS,128). Returns (N,1,128)."""
    n = xp.shape[0]
    return pl.pallas_call(
        mlp_kernel,
        out_shape=jax.ShapeDtypeStruct((n, 1, 128), jnp.float32),
        grid=(n,),
        in_specs=[
            pl.BlockSpec((None, 16, 128), lambda i: (i, 0, 0)),   # per-request tile
            pl.BlockSpec((P_ROWS, 128), lambda i: (0, 0)),        # constant -> params DMA'd once
        ],
        out_specs=pl.BlockSpec((None, 1, 128), lambda i: (i, 0, 0)),
        compiler_params=pltpu.CompilerParams(
            dimension_semantics=("parallel",)),                   # 2 TCs on v7x
    )(xp, packed)


@jax.jit
def model_forward(x, packed_params):
    """Single forward: x is (10,10) (batch MUST be 10, as in the torch module)."""
    xp = jnp.zeros((1, 16, 128), jnp.float32).at[0, :10, :10].set(x)
    out = _forward_padded(xp, packed_params)
    return out[0, 0, OUT_LANE:OUT_LANE + 2]          # torch output shape (2,)


@jax.jit
def model_forward_batched(xs, packed_params):
    """N independent (10,10) inputs in one pallas_call (amortizes dispatch + param DMA)."""
    n = xs.shape[0]
    xp = jnp.zeros((n, 16, 128), jnp.float32).at[:, :10, :10].set(xs)
    out = _forward_padded(xp, packed_params)
    return out[:, 0, OUT_LANE:OUT_LANE + 2]          # (N, 2)


# ------------------------------- reference ---------------------------------
def reference_forward(x, params):
    """Pure-JAX reference reproducing the PyTorch forward exactly (no folding)."""
    def lin(p, v):
        w, b = p
        return v @ w.T + b
    o = lin(params["lin0"], x)
    o = jax.nn.relu(lin(params["lin0_1"], o))
    o = jax.nn.relu(lin(params["lin0_2"], o))
    o = jnp.squeeze(o)                        # (10,)
    o = jax.nn.relu(lin(params["lin1"], o))   # (100,)
    o = jax.nn.relu(lin(params["lin2"], o))   # (100,)
    o = jax.nn.relu(lin(params["lin3"], o))   # (2,)
    return o


if __name__ == "__main__":
    key = jax.random.PRNGKey(0)
    kx, kp, kb = jax.random.split(key, 3)

    # Batch MUST be 10 for the module's squeeze->Linear(10,...) path to work.
    x = jax.random.normal(kx, (10, 10), jnp.float32)
    params = init_params(kp)

    packed = jax.block_until_ready(pack_params(params))     # one-time prep

    # Single forward.
    out = jax.block_until_ready(model_forward(x, packed))
    ref = reference_forward(x, params)
    assert out.shape == (2,)
    # atol relaxed slightly: folding lin0 into lin0_1 changes f32 rounding.
    assert jnp.allclose(out, ref, atol=1e-4, rtol=1e-4), (out, ref)

    # Batched forward (4 independent requests in one call, parallel grid axis).
    xs = jax.random.normal(kb, (4, 10, 10), jnp.float32)
    outs = jax.block_until_ready(model_forward_batched(xs, packed))
    refs = jnp.stack([reference_forward(xs[i], params) for i in range(4)])
    assert outs.shape == (4, 2)
    assert jnp.allclose(outs, refs, atol=1e-4, rtol=1e-4), (outs, refs)

    print("KERNEL_OK")
</pallas_src>

<mosaic_0001>
module attributes {stable_mosaic.version = 11 : i64} {
  func.func @mlp_kernel(%arg0: i32, %arg1: memref<1x16x128xf32, #tpu.memory_space<vmem>>, %arg2: memref<160x128xf32, #tpu.memory_space<vmem>>, %arg3: memref<1x1x128xf32, #tpu.memory_space<vmem>>) attributes {dimension_semantics = [#tpu.dimension_semantics<parallel>], iteration_bounds = array<i64: 1>, scalar_prefetch = 0 : i64, scratch_operands = 0 : i64, tpu.core_type = #tpu.core_type<tc>, window_params = [{transform_indices = @transform_0, window_bounds = array<i64: 1, 16, 128>}, {pipeline_mode = #tpu.pipeline_mode<synchronous>, transform_indices = @transform_1, window_bounds = array<i64: 160, 128>}, {transform_indices = @transform_2, window_bounds = array<i64: 1, 1, 128>}]} {
    %c0 = arith.constant 0 : index
    %c0_0 = arith.constant 0 : index
    %c0_1 = arith.constant 0 : index
    %0 = vector.load %arg1[%c0, %c0_0, %c0_1] : memref<1x16x128xf32, #tpu.memory_space<vmem>>, vector<1x16x16xf32>
    %1 = vector.shape_cast %0 : vector<1x16x16xf32> to vector<16x16xf32>
    %c0_2 = arith.constant 0 : index
    %c0_3 = arith.constant 0 : index
    %2 = vector.load %arg2[%c0_2, %c0_3] : memref<160x128xf32, #tpu.memory_space<vmem>>, vector<16x128xf32>
    %c10 = arith.constant 10 : index
    %c0_4 = arith.constant 0 : index
    %3 = vector.load %arg2[%c10, %c0_4] : memref<160x128xf32, #tpu.memory_space<vmem>>, vector<1x128xf32>
    %c11 = arith.constant 11 : index
    %c0_5 = arith.constant 0 : index
    %4 = vector.load %arg2[%c11, %c0_5] : memref<160x128xf32, #tpu.memory_space<vmem>>, vector<1x128xf32>
    %c12 = arith.constant 12 : index
    %c0_6 = arith.constant 0 : index
    %5 = vector.load %arg2[%c12, %c0_6] : memref<160x128xf32, #tpu.memory_space<vmem>>, vector<1x128xf32>
    %c13 = arith.constant 13 : index
    %c0_7 = arith.constant 0 : index
    %6 = vector.load %arg2[%c13, %c0_7] : memref<160x128xf32, #tpu.memory_space<vmem>>, vector<1x128xf32>
    %c16 = arith.constant 16 : index
    %c0_8 = arith.constant 0 : index
    %7 = vector.load %arg2[%c16, %c0_8] : memref<160x128xf32, #tpu.memory_space<vmem>>, vector<16x128xf32>
    %c32 = arith.constant 32 : index
    %c0_9 = arith.constant 0 : index
    %8 = vector.load %arg2[%c32, %c0_9] : memref<160x128xf32, #tpu.memory_space<vmem>>, vector<128x128xf32>
    %cst = arith.constant dense<0.000000e+00> : vector<16x128xf32>
    %9 = tpu.matmul %1, %2, %cst {dimension_numbers = #tpu.dot_dimension_numbers<[1], [0], [0], [1], [0, 0, 1, 1], [], []>} : vector<16x16xf32>, vector<16x128xf32>, vector<16x128xf32> -> vector<16x128xf32>
    %10 = vector.broadcast %3 : vector<1x128xf32> to vector<16x128xf32>
    %11 = arith.addf %9, %10 : vector<16x128xf32>
    %cst_10 = arith.constant 0.000000e+00 : f32
    %12 = vector.broadcast %cst_10 : f32 to vector<16x128xf32>
    %13 = arith.maximumf %11, %12 : vector<16x128xf32>
    %14 = vector.broadcast %4 : vector<1x128xf32> to vector<16x128xf32>
    %15 = arith.mulf %13, %14 : vector<16x128xf32>
    %cst_11 = arith.constant dense<0.000000e+00> : vector<16xf32>
    %16 = vector.multi_reduction <add>, %15, %cst_11 [1] : vector<16x128xf32> to vector<16xf32>
    %17 = vector.shape_cast %16 : vector<16xf32> to vector<16x1xf32>
    %cst_12 = arith.constant 0.000000e+00 : f32
    %18 = vector.broadcast %cst_12 : f32 to vector<16x1xf32>
    %19 = arith.maximumf %17, %18 : vector<16x1xf32>
    %20 = vector.broadcast %19 : vector<16x1xf32> to vector<16x128xf32>
    %21 = arith.mulf %20, %7 : vector<16x128xf32>
    %cst_13 = arith.constant dense<0.000000e+00> : vector<128xf32>
    %22 = vector.multi_reduction <add>, %21, %cst_13 [0] : vector<16x128xf32> to vector<128xf32>
    %23 = vector.shape_cast %22 : vector<128xf32> to vector<1x128xf32>
    %24 = arith.addf %23, %5 : vector<1x128xf32>
    %cst_14 = arith.constant 0.000000e+00 : f32
    %25 = vector.broadcast %cst_14 : f32 to vector<1x128xf32>
    %26 = arith.maximumf %24, %25 : vector<1x128xf32>
    %cst_15 = arith.constant dense<0.000000e+00> : vector<1x128xf32>
    %27 = tpu.matmul %26, %8, %cst_15 {dimension_numbers = #tpu.dot_dimension_numbers<[1], [0], [0], [1], [0, 0, 1, 1], [], []>} : vector<1x128xf32>, vector<128x128xf32>, vector<1x128xf32> -> vector<1x128xf32>
    %28 = arith.addf %27, %6 : vector<1x128xf32>
    %cst_16 = arith.constant 0.000000e+00 : f32
    %29 = vector.broadcast %cst_16 : f32 to vector<1x128xf32>
    %30 = arith.maximumf %28, %29 : vector<1x128xf32>
    %cst_17 = arith.constant dense<0.000000e+00> : vector<1x128xf32>
    %31 = tpu.matmul %30, %8, %cst_17 {dimension_numbers = #tpu.dot_dimension_numbers<[1], [0], [0], [1], [0, 0, 1, 1], [], []>} : vector<1x128xf32>, vector<128x128xf32>, vector<1x128xf32> -> vector<1x128xf32>
    %cst_18 = arith.constant 0.000000e+00 : f32
    %32 = vector.broadcast %cst_18 : f32 to vector<1x128xf32>
    %33 = arith.maximumf %31, %32 : vector<1x128xf32>
    %c0_19 = arith.constant 0 : index
    %c0_20 = arith.constant 0 : index
    %c0_21 = arith.constant 0 : index
    %34 = vector.load %arg3[%c0_19, %c0_20, %c0_21] : memref<1x1x128xf32, #tpu.memory_space<vmem>>, vector<1x1x128xf32>
    %35 = vector.shape_cast %34 : vector<1x1x128xf32> to vector<1x128xf32>
    %36 = vector.shape_cast %33 : vector<1x128xf32> to vector<1x1x128xf32>
    tpu.vector_store %arg3[%c0_19, %c0_20, %c0_21], %36 {strides = array<i32>} : memref<1x1x128xf32, #tpu.memory_space<vmem>>, vector<1x1x128xf32>,
    return
  }
  func.func @transform_0(%arg0: i32) -> (i32, i32, i32) {
    %c0_i32 = arith.constant 0 : i32
    %c0_i32_0 = arith.constant 0 : i32
    %c0_i32_1 = arith.constant 0 : i32
    return %arg0, %c0_i32, %c0_i32_0 : i32, i32, i32
  }
  func.func @transform_1(%arg0: i32) -> (i32, i32) {
    %c0_i32 = arith.constant 0 : i32
    %c0_i32_0 = arith.constant 0 : i32
    %c0_i32_1 = arith.constant 0 : i32
    return %c0_i32, %c0_i32_0 : i32, i32
  }
  func.func @transform_2(%arg0: i32) -> (i32, i32, i32) {
    %c0_i32 = arith.constant 0 : i32
    %c0_i32_0 = arith.constant 0 : i32
    %c0_i32_1 = arith.constant 0 : i32
    return %arg0, %c0_i32, %c0_i32_0 : i32, i32, i32
  }
}

</mosaic_0001>

<bundles_post_ra>
// kernel: model_forward.1
= control target key start
LH: loop header
LB: loop body
LE: loop exit
PB: predicated region body
PF: predicated region fallthrough
CT: control target
= control target key end

     0   :  { %7 = vsyncpa [#allocation3], 0  ;;  %s187_s12 = smov [#allocation2]   ;;  %s188_s14 = smov 128   ;;  %s217_s0 = inlined_call_operand.vmem [shape: f32[1,16,128], index: 0, kind: input, shape index: {}]   ;;  %s218_s1 = inlined_call_operand.hbm [shape: f32[160,128], index: 1, kind: input, shape index: {}]   ;;  %s219_s2 = inlined_call_operand.vmem [shape: f32[1,1,128], index: 2, kind: output, shape index: {}]  }
   0x1   :  { %s14_s11 = sshll.u32 %s218_s1, 4  ;;  %s16_s13 = sshll.u32 %s187_s12, 4  ;;  %s15_s11 = int_to_ptr.hbm [resolvable:$true] %s14_s11  ;;  %s17_s13 = int_to_ptr.vmem [resolvable:$true] %s16_s13 }
   0x2   :  { %s189_s15 = smov 8  }
   0x3   :  { %22 = dma.hbm_to_vmem [thread:$0]  %s15_s11, 2560, %s17_s13, [#allocation3], %s188_s14, %s188_s14, %s189_s15  }
   0x4   :  { %185 = dma.done.wait [#allocation3], 2560  }
   0x5   :  { %186 = vsyncadd [#allocation3], 4294964736  ;;  %v30_v0 = vld [vmem:[#allocation2 + $0x8] sm:$0xff]  ;;  %v29_v1 = vld [vmem:[#allocation2] sm:$0xff]  ;;  %vm54_vm0 = vcmask 130048  }
   0x6   :  { %75 = vmatpush.msra.mxu0 %v30_v0  ;;  %v27_v2 = vld [vmem:[%s217_s0] sm:$0xff]  ;;  %v28_v3 = vld [vmem:[%s217_s0 + $0x8] sm:$0xff]  ;;  %v52_v4 = vld [vmem:[#allocation2 + $0x98] sm:$0xff] }
   0x7   :  { %106 = vmatpush.msra.mxu1 %v52_v4  ;;  %127 = vmatpush.msra.mxu2 %v52_v4  ;;  %v159_v5 = vld [vmem:[#allocation2 + $0xa] ss:$0 sm:$0xff]  ;;  %v160_v8 = vld [vmem:[#allocation2 + $0xb] ss:$0 sm:$0xff]  ;;  %v51_v15 = vld [vmem:[#allocation2 + $0x90] sm:$0xff] }
   0x8   :  { %76 = vmatpush.msra.mxu0 %v29_v1  ;;  %v50_v16 = vld [vmem:[#allocation2 + $0x88] sm:$0xff]  ;;  %v49_v17 = vld [vmem:[#allocation2 + $0x80] sm:$0xff]  ;;  %v48_v18 = vld [vmem:[#allocation2 + $0x78] sm:$0xff] }
   0x9   :  { %154 = vmatmul.msk.f32.vlgmr.msra.gmra.mxu0 %vm54_vm0, %v27_v2  ;;  %107 = vmatpush.msra.mxu1 %v51_v15  ;;  %v47_v19 = vld [vmem:[#allocation2 + $0x70] sm:$0xff]  ;;  %v46_v20 = vld [vmem:[#allocation2 + $0x68] sm:$0xff]  ;;  %v45_v21 = vld [vmem:[#allocation2 + $0x60] sm:$0xff] }
   0xa   :  { %128 = vmatpush.msra.mxu2 %v51_v15  ;;  %v44_v22 = vld [vmem:[#allocation2 + $0x58] sm:$0xff]  ;;  %v43_v23 = vld [vmem:[#allocation2 + $0x50] sm:$0xff]  ;;  %v42_v24 = vld [vmem:[#allocation2 + $0x48] sm:$0xff] }
   0xb   :  { %108 = vmatpush.msra.mxu1 %v50_v16  ;;  %v41_v25 = vld [vmem:[#allocation2 + $0x40] sm:$0xff]  ;;  %v40_v26 = vld [vmem:[#allocation2 + $0x38] sm:$0xff]  ;;  %v39_v27 = vld [vmem:[#allocation2 + $0x30] sm:$0xff] }
   0xc   :  { %129 = vmatpush.msra.mxu2 %v50_v16  ;;  %v38_v28 = vld [vmem:[#allocation2 + $0x28] sm:$0xff]  ;;  %v37_v29 = vld [vmem:[#allocation2 + $0x20] sm:$0xff]  ;;  %v35_v32 = vld [vmem:[#allocation2 + $0x10] sm:$0xff] }
   0xd   :  { %109 = vmatpush.msra.mxu1 %v49_v17  ;;  %v36_v33 = vld [vmem:[#allocation2 + $0x18] sm:$0xff]  ;;  %v33_v44 = vld [vmem:[#allocation2 + $0xc] sm:$0x1]  ;;  %v34_v48 = vld [vmem:[#allocation2 + $0xd] sm:$0x1] }
   0xe   :  { %130 = vmatpush.msra.mxu2 %v49_v17 }
   0xf   :  { %110 = vmatpush.msra.mxu1 %v48_v18 }
  0x10   :  { %131 = vmatpush.msra.mxu2 %v48_v18 }
  0x11   :  { %155 = vmatmul.msk.f32.gmra.mxu0 %vm54_vm0, %v28_v3  ;;  %111 = vmatpush.msra.mxu1 %v47_v19 }
  0x12   :  { %132 = vmatpush.msra.mxu2 %v47_v19 }
  0x13   :  { %112 = vmatpush.msra.mxu1 %v46_v20 }
  0x14   :  { %133 = vmatpush.msra.mxu2 %v46_v20 }
  0x15   :  { %113 = vmatpush.msra.mxu1 %v45_v21 }
  0x16   :  { %134 = vmatpush.msra.mxu2 %v45_v21 }
  0x17   :  { %114 = vmatpush.msra.mxu1 %v44_v22 }
  0x18   :  { %135 = vmatpush.msra.mxu2 %v44_v22 }
  0x19   :  { %115 = vmatpush.msra.mxu1 %v43_v23 }
  0x1a   :  { %136 = vmatpush.msra.mxu2 %v43_v23 }
  0x1b   :  { %116 = vmatpush.msra.mxu1 %v42_v24 }
  0x1c   :  { %137 = vmatpush.msra.mxu2 %v42_v24 }
  0x1d   :  { %117 = vmatpush.msra.mxu1 %v41_v25 }
  0x1e   :  { %138 = vmatpush.msra.mxu2 %v41_v25 }
  0x1f   :  { %118 = vmatpush.msra.mxu1 %v40_v26 }
  0x20   :  { %139 = vmatpush.msra.mxu2 %v40_v26 }
  0x21   :  { %119 = vmatpush.msra.mxu1 %v39_v27 }
  0x22   :  { %140 = vmatpush.msra.mxu2 %v39_v27 }
  0x23   :  { %120 = vmatpush.msra.mxu1 %v38_v28 }
  0x24   :  { %141 = vmatpush.msra.mxu2 %v38_v28 }
  0x25   :  { %121 = vmatpush.msra.mxu1 %v37_v29 }
  0x26   :  { %142 = vmatpush.msra.mxu2 %v37_v29 }
  0x86   :  { %v78_v6 = vpop.f32.mrf.mxu0 }
  0x87   :  { %v79_v7 = vadd.f32 %v159_v5, %v78_v6 }
  0x89   :  { %v84_v9 = vmax.f32 %v79_v7, 0.0 }
  0x8b   :  { %v87_v10 = vmul.f32 %v160_v8, %v84_v9 }
  0x8d   :  { %89 = vadd.xlane.f32.xlu0 %v87_v10 }
  0x8e   :  { %v81_v11 = vpop.f32.mrf.mxu0 }
  0x8f   :  { %v82_v12 = vadd.f32 %v159_v5, %v81_v11 }
  0x91   :  { %v85_v13 = vmax.f32 %v82_v12, 0.0 }
  0x93   :  { %v88_v14 = vmul.f32 %v160_v8, %v85_v13 }
  0x95   :  { %91 = vadd.xlane.f32.xlu0 %v88_v14 }
 0x100   :  { %v90_v30 = vpop.xlane.xlu0 %89 }
 0x101   :  { %v93_v31 = vmax.f32 %v90_v30, 0.0 }
 0x103   :  { %v95_v36 = vmul.f32 %v93_v31, %v35_v32 }
 0x108   :  { %v92_v34 = vpop.xlane.xlu0 %91 }
 0x109   :  { %v94_v35 = vmax.f32 %v92_v34, 0.0 }
 0x10b   :  { %v96_v37 = vmul.f32 %v94_v35, %v36_v33 }
 0x10d   :  { %v97_v38 = vadd.f32 %v96_v37, %v95_v36 }
 0x10f   :  { %v98_v39 = vrot.slane %v97_v38, 4 }
 0x111   :  { %v99_v40 = vadd.f32 %v98_v39, %v97_v38 }
 0x113   :  { %v100_v41 = vrot.slane %v99_v40, 2 }
 0x115   :  { %v101_v42 = vadd.f32 %v100_v41, %v99_v40 }
 0x117   :  { %v102_v43 = vrot.slane %v101_v42, 1 }
 0x119   :  { %v103_v45 = vadd.f32 %v102_v43, %v101_v42 }
 0x11b   :  { %v104_v46 = vadd.f32 %v103_v45, %v33_v44 }
 0x11d   :  { %v105_v47 = vmax.f32 %v104_v46, 0.0 }
 0x11f   :  { %122 = vmatmul.f32.vlgmr.msra.gmra.mxu1 %v105_v47 }
 0x19c   :  { %v123_v49 = vpop.f32.mrf.mxu1 }
 0x19d   :  { %v124_v50 = vadd.f32 %v123_v49, %v34_v48 }
 0x19f   :  { %v126_v51 = vmax.f32 %v124_v50, 0.0 }
 0x1a1   :  { %143 = vmatmul.f32.vlgmr.msra.gmra.mxu2 %v126_v51 }
 0x224   :  { %v144_v52 = vpop.f32.mrf.mxu2 }
 0x225   :  { %v147_v53 = vmax.f32 %v144_v52, 0.0 }
 0x227   :  { %148 = vst [vmem:[%s219_s2] sm:$0x1] %v147_v53 }
 0x228   :  { %153 = vsyncpa [#allocation3], 1 }

</bundles_post_ra>
